<compile_context>
chip_gen: v5e
topology: v5e:2x2
jax: 0.10.0
libtpu: 0.0.40
codegen_flags: <defaults>
</compile_context>

<pallas_src>
import functools

import jax
import jax.numpy as jnp
from jax.experimental import pallas as pl
from jax.experimental.pallas import tpu as pltpu


def _round_up(x: int, m: int) -> int:
    return (x + m - 1) // m * m


def _dropout_threshold_u32(p: float) -> int:
    # keep element iff bits >= threshold, so P(keep) = 1 - p exactly (to 2^-32).
    return min(int(round(p * 4294967296.0)), 4294967295)


def _regression_head_kernel(*refs, p, training):
    if training and p > 0.0:
        x_ref, bits_ref, wt_ref, b_ref, o_ref = refs
    else:
        x_ref, wt_ref, b_ref, o_ref = refs
        bits_ref = None

    x = x_ref[...].astype(jnp.float32)                      # (tm, in_dim)

    if training and p > 0.0:
        # Integer-threshold dropout mask (no shift / int->float / fmul).
        thr = jnp.uint32(_dropout_threshold_u32(p))
        keep = bits_ref[...] >= thr
        x = jnp.where(keep, x, jnp.float32(0.0))

    # Linear: W is pre-transposed & lane-padded -> (in_dim, out_pad).
    y = jnp.dot(x, wt_ref[...].astype(jnp.float32),
                preferred_element_type=jnp.float32)         # (tm, out_pad)

    if training and p > 0.0:
        # Hoisted survivor scale: tm*out_pad multiplies instead of tm*in_dim.
        y = y * jnp.float32(1.0 / (1.0 - p))

    o_ref[...] = (y + b_ref[...].astype(jnp.float32)).astype(o_ref.dtype)


def regression_head(x, w, b, *, p=0.75, training=True, dropout_key=None, tm=128):
    """y = Linear(Dropout_p(x)).

    x: (B, in_dim) f32; w: (out_dim, in_dim) (PyTorch layout); b: (out_dim,) f32.
    Returns (B, out_dim).
    """
    batch, in_dim = x.shape
    out_dim, in_dim_w = w.shape
    assert in_dim == in_dim_w
    assert in_dim % 128 == 0, "in_dim must be a multiple of 128 (lane-aligned)"

    out_pad = _round_up(out_dim, 128)          # lane-dense output slab
    tm = max(8, min(_round_up(tm, 8), _round_up(batch, 8)))
    batch_pad = _round_up(batch, tm)
    grid = (batch_pad // tm,)

    # Pre-transpose W -> (in_dim, out_pad), zero-pad lanes; zero-pad bias too so the
    # sliced output is unchanged.
    wt = jnp.zeros((in_dim, out_pad), dtype=w.dtype).at[:, :out_dim].set(w.T)
    b2d = jnp.zeros((1, out_pad), dtype=b.dtype).at[0, :out_dim].set(b)

    x_in = x
    if batch_pad != batch:
        x_in = jnp.zeros((batch_pad, in_dim), x.dtype).at[:batch].set(x)

    use_dropout = training and p > 0.0

    inputs = [x_in]
    in_specs = [pl.BlockSpec((tm, in_dim), lambda i: (i, 0))]            # x tiles
    if use_dropout:
        if dropout_key is None:
            dropout_key = jax.random.PRNGKey(0)
        bits = jax.random.bits(dropout_key, (batch_pad, in_dim), dtype=jnp.uint32)
        inputs.append(bits)
        in_specs.append(pl.BlockSpec((tm, in_dim), lambda i: (i, 0)))    # bits tiles
    inputs += [wt, b2d]
    in_specs += [
        pl.BlockSpec((in_dim, out_pad), lambda i: (0, 0)),   # W: resident across grid
        pl.BlockSpec((1, out_pad), lambda i: (0, 0)),        # bias: resident
    ]

    kernel = functools.partial(_regression_head_kernel, p=p, training=training)

    itemsize = 4
    bytes_accessed = (x_in.size + wt.size + b2d.size + batch_pad * out_pad) * itemsize
    if use_dropout:
        bytes_accessed += batch_pad * in_dim * 4
    cost = pl.CostEstimate(flops=2 * batch_pad * in_dim * out_pad,
                           transcendentals=0,
                           bytes_accessed=bytes_accessed)

    out = pl.pallas_call(
        kernel,
        out_shape=jax.ShapeDtypeStruct((batch_pad, out_pad), x.dtype),
        grid=grid,
        in_specs=in_specs,
        out_specs=pl.BlockSpec((tm, out_pad), lambda i: (i, 0)),
        compiler_params=pltpu.CompilerParams(
            dimension_semantics=("parallel",)),   # batch tiles shard across TCs (v7x)
        cost_estimate=cost,
    )(*inputs)

    return out[:batch, :out_dim]


if __name__ == "__main__":
    # Model dims: in_dim = resnet_feature_length(512) + clip_length(768) = 1280.
    # Two regression heads, as in AestheticModel: base score (out=1) and
    # attribute scores (out=num_attributes).
    batch = 16
    in_dim = 512 + 768
    num_attributes = 8
    p = 0.75

    key = jax.random.PRNGKey(0)
    kx, kw1, kb1, kw2, kb2, kd = jax.random.split(key, 6)

    x = jax.random.normal(kx, (batch, in_dim), dtype=jnp.float32)
    bound = 1.0 / float(in_dim) ** 0.5
    w_attr = jax.random.uniform(kw1, (num_attributes, in_dim),
                                minval=-bound, maxval=bound, dtype=jnp.float32)
    b_attr = jax.random.uniform(kb1, (num_attributes,),
                                minval=-bound, maxval=bound, dtype=jnp.float32)
    w_base = jax.random.uniform(kw2, (1, in_dim),
                                minval=-bound, maxval=bound, dtype=jnp.float32)
    b_base = jax.random.uniform(kb2, (1,),
                                minval=-bound, maxval=bound, dtype=jnp.float32)

    # --- eval mode (dropout = identity): verify against pure-JAX reference -------
    attr_eval = regression_head(x, w_attr, b_attr, p=p, training=False, tm=8)
    base_eval = regression_head(x, w_base, b_base, p=p, training=False, tm=8)
    jax.block_until_ready((attr_eval, base_eval))

    ref_attr = jnp.dot(x, w_attr.T, precision=jax.lax.Precision.HIGHEST) + b_attr
    ref_base = jnp.dot(x, w_base.T, precision=jax.lax.Precision.HIGHEST) + b_base
    assert attr_eval.shape == (batch, num_attributes)
    assert base_eval.shape == (batch, 1)
    assert jnp.allclose(attr_eval, ref_attr, atol=1e-2, rtol=1e-2), "attr eval mismatch"
    assert jnp.allclose(base_eval, ref_base, atol=1e-2, rtol=1e-2), "base eval mismatch"

    # --- training mode (nn.Module default): dropout p=0.75 -----------------------
    attr_train = regression_head(x, w_attr, b_attr, p=p, training=True,
                                 dropout_key=kd, tm=8)
    attr_train = jax.block_until_ready(attr_train)

    # Reference using the identical random bits / threshold as the kernel.
    bits = jax.random.bits(kd, (batch, in_dim), dtype=jnp.uint32)
    thr = jnp.uint32(_dropout_threshold_u32(p))
    x_drop = jnp.where(bits >= thr, x, 0.0)
    ref_train = (jnp.dot(x_drop, w_attr.T, precision=jax.lax.Precision.HIGHEST)
                 * (1.0 / (1.0 - p)) + b_attr)
    assert attr_train.shape == (batch, num_attributes)
    assert jnp.allclose(attr_train, ref_train, atol=1e-2, rtol=1e-2), "train mismatch"

    print("KERNEL_OK")
</pallas_src>

<mosaic_0001>
module attributes {stable_mosaic.version = 11 : i64} {
  func.func @_regression_head_kernel(%arg0: i32, %arg1: memref<8x1280xf32, #tpu.memory_space<vmem>>, %arg2: memref<1280x128xf32, #tpu.memory_space<vmem>>, %arg3: memref<1x128xf32, #tpu.memory_space<vmem>>, %arg4: memref<8x128xf32, #tpu.memory_space<vmem>>) attributes {dimension_semantics = [#tpu.dimension_semantics<parallel>], iteration_bounds = array<i64: 2>, scalar_prefetch = 0 : i64, scratch_operands = 0 : i64, tpu.core_type = #tpu.core_type<tc>, window_params = [{transform_indices = @transform_0, window_bounds = array<i64: 8, 1280>}, {pipeline_mode = #tpu.pipeline_mode<synchronous>, transform_indices = @transform_1, window_bounds = array<i64: 1280, 128>}, {pipeline_mode = #tpu.pipeline_mode<synchronous>, transform_indices = @transform_2, window_bounds = array<i64: 1, 128>}, {transform_indices = @transform_3, window_bounds = array<i64: 8, 128>}]} {
    %c0 = arith.constant 0 : index
    %c0_0 = arith.constant 0 : index
    %0 = vector.load %arg1[%c0, %c0_0] : memref<8x1280xf32, #tpu.memory_space<vmem>>, vector<8x1280xf32>
    %c0_1 = arith.constant 0 : index
    %c0_2 = arith.constant 0 : index
    %1 = vector.load %arg2[%c0_1, %c0_2] : memref<1280x128xf32, #tpu.memory_space<vmem>>, vector<1280x128xf32>
    %cst = arith.constant dense<0.000000e+00> : vector<8x128xf32>
    %2 = tpu.matmul %0, %1, %cst {dimension_numbers = #tpu.dot_dimension_numbers<[1], [0], [0], [1], [0, 0, 1, 1], [], []>} : vector<8x1280xf32>, vector<1280x128xf32>, vector<8x128xf32> -> vector<8x128xf32>
    %c0_3 = arith.constant 0 : index
    %c0_4 = arith.constant 0 : index
    %3 = vector.load %arg3[%c0_3, %c0_4] : memref<1x128xf32, #tpu.memory_space<vmem>>, vector<1x128xf32>
    %4 = vector.broadcast %3 : vector<1x128xf32> to vector<8x128xf32>
    %5 = arith.addf %2, %4 : vector<8x128xf32>
    %c0_5 = arith.constant 0 : index
    %c0_6 = arith.constant 0 : index
    %6 = vector.load %arg4[%c0_5, %c0_6] : memref<8x128xf32, #tpu.memory_space<vmem>>, vector<8x128xf32>
    tpu.vector_store %arg4[%c0_5, %c0_6], %5 {strides = array<i32>} : memref<8x128xf32, #tpu.memory_space<vmem>>, vector<8x128xf32>,
    return
  }
  func.func @transform_0(%arg0: i32) -> (i32, i32) {
    %c0_i32 = arith.constant 0 : i32
    %c0_i32_0 = arith.constant 0 : i32
    return %arg0, %c0_i32 : i32, i32
  }
  func.func @transform_1(%arg0: i32) -> (i32, i32) {
    %c0_i32 = arith.constant 0 : i32
    %c0_i32_0 = arith.constant 0 : i32
    %c0_i32_1 = arith.constant 0 : i32
    return %c0_i32, %c0_i32_0 : i32, i32
  }
  func.func @transform_2(%arg0: i32) -> (i32, i32) {
    %c0_i32 = arith.constant 0 : i32
    %c0_i32_0 = arith.constant 0 : i32
    %c0_i32_1 = arith.constant 0 : i32
    return %c0_i32, %c0_i32_0 : i32, i32
  }
  func.func @transform_3(%arg0: i32) -> (i32, i32) {
    %c0_i32 = arith.constant 0 : i32
    %c0_i32_0 = arith.constant 0 : i32
    return %arg0, %c0_i32 : i32, i32
  }
}

</mosaic_0001>

<bundles_post_ra>
// kernel: tpu_custom_call.1
= control target key start
LH: loop header
LB: loop body
LE: loop exit
PB: predicated region body
PF: predicated region fallthrough
CT: control target
= control target key end

     0   :  { %8 = vsyncpa [#allocation3], 0  ;;  %s1059_s0 = inlined_call_operand.hbm [shape: f32[16,1280], index: 0, kind: input, shape index: {}]   ;;  %s1060_s1 = inlined_call_operand.hbm [shape: f32[1280,128], index: 1, kind: input, shape index: {}]   ;;  %s1061_s2 = inlined_call_operand.vmem [shape: f32[1,128], index: 2, kind: input, shape index: {}]   ;;  %s1062_s3 = inlined_call_operand.hbm [shape: f32[16,128], index: 3, kind: output, shape index: {}]  }
   0x1   :  { %10 = vsyncpa [#allocation3 + $0x1], 0 }
   0x2   :  { %11 = vsyncpa [#allocation6], 0 }
   0x3   :  { %12 = vsyncpa [#allocation4], 0 }
   0x4   :  { %14 = vsyncpa [#allocation4 + $0x1], 0  ;;  %s907_s12 = smov 0   ;;  %s909_s13 = smov 0  }
   0x5   :  { %s911_s14 = smov 0   ;;  %s913_s15 = smov 0  }
   0x6 LB: > { %s130_s18 = sshll.u32 %s1060_s1, 4  ;;  %s931_s19 = sadd.s32 4294967295, %s882_s15   ;;  %s882_s15 = sphi %s913_s15, %s1072_s15   ;;  %s878_s14 = sphi %s911_s14, %s1071_s14   ;;  %s874_s13 = sphi %s909_s13, %s1070_s13   ;;  %s870_s12 = sphi %s907_s12, %s1069_s12   ;;  %s131_s18 = int_to_ptr.hbm [resolvable:$true] %s130_s18 }
   0x7   : > { %p678_p0 = scmp.ge.s32.totalorder %s882_s15, 1  ;;  %p41_p1 = scmp.eq.s32.totalorder %s931_s19, 0 }
   0x8   : > { %p119_p2 = scmp.lt.s32.totalorder %s882_s15, 3  ;;  %s884_s21 = smov [#allocation5]  }
   0x9   : > { %s132_s22 = sshll.u32 %s884_s21, 4  ;;  %s885_s23 = smov 128   ;;  %s133_s22 = int_to_ptr.vmem [resolvable:$true] %s132_s22 }
   0xa   : > { %p936_p3 = pnand %p678_p0, %p119_p2  ;;  %s886_s24 = smov 8  }
   0xb   : > { %s677_s25 = sadd.s32 4294967294, %s882_s15   ;;  %s947_s26 = sadd.s32 1, %s882_s15  }
   0xc   : > { %p700_p4 = pneg %p936_p3  ;;  %s27_s27 = sadd.s32 1, %s878_s14 }
   0xd   : > { %s24_s28 = ssub.s32 %s882_s15, %s947_s26  ;;  %p34_p7 = scmp.ne.s32.totalorder %s878_s14, %s874_s13 }
   0xe   : > { %p701_p6 = pnand %p700_p4, %p41_p1  ;;  %p25_p8 = scmp.eq.s32.totalorder %s24_s28, 0 }
   0xf   : > { %p35_p9 = scmp.eq.s32.totalorder %s882_s15, 0  ;;  %p40_p10 = scmp.ne.s32.totalorder %s874_s13, %s870_s12 }
  0x10   : > { %703 = dma.hbm_to_vmem [thread:$0]  (!%p701_p6), %s131_s18, 20480, %s133_s22, [#allocation6], %s885_s23, %s885_s23, %s886_s24  }
  0x11   : > { %p106_p11 = scmp.eq.s32.totalorder %s931_s19, 1  ;;  %p36_p12 = por %p35_p9, %p34_p7 }
  0x12   : > { %s959_s29 = scalar_select %p25_p8, %s878_s14, %s27_s27  }
  0x13   : > { %p963_p13 = por %p41_p1, %p40_p10  ;;  %p967_p0 = por %p106_p11, %p34_p7 }
  0x14   : > { %p112_p2 = scmp.eq.s32.totalorder %s677_s25, 1  ;;  %p713_p4 = scmp.lt.s32.totalorder %s882_s15, 2 }
  0x15   : > { %s149_s5 = sand.u32 1, %s878_s14   ;;  %s690_s9 = smul.u32 80, %s882_s15 }
  0x16   : > { %p973_p6 = por %p112_p2, %p40_p10  ;;  %s689_s7 = smul.u32 80, %s149_s5 }
  0x17   : > { %p977_p8 = pnand %p713_p4, %p36_p12  ;;  %s158_s16 = scalar_lea.hbm %s1059_s0, %s690_s9 }
  0x18   : > { %s153_s17 = scalar_lea.vmem [#allocation2], %s689_s7  ;;  %s160_s21 = sshll.u32 %s158_s16, 4  ;;  %s161_s21 = int_to_ptr.hbm [resolvable:$true] %s160_s21 }
  0x19   : > { %s162_s18 = sshll.u32 %s153_s17, 4  ;;  %s150_s22 = scalar_lea.sflag [#allocation3], %s149_s5  ;;  %s163_s18 = int_to_ptr.vmem [resolvable:$true] %s162_s18 }
  0x1a   : > { %s782_s23 = sshra.s32 %s161_s21, 4  ;;  %p786_p9 = pneg %p977_p8  ;;  %s783_s23 = int_to_ptr.hbm [resolvable:$true] %s782_s23 }
  0x1b   : > { %s784_s24 = scalar_lea.hbm %s783_s23, 80  ;;  %s789_s28 = scalar_lea.hbm %s1059_s0, 160 }
  0x1c   : > { %p785_p7 = scmp.ne.s32.totalorder %s783_s23, %s784_s24  ;;  %p790_p12 = scmp.lt.s32.totalorder %s783_s23, %s1059_s0 }
  0x1d   : > { %p791_p2 = scmp.lt.s32.totalorder %s789_s28, %s784_s24 }
  0x1e   : > { %p787_p10 = pnand %p786_p9, %p785_p7 }
  0x1f   : > { %p792_p4 = por %p791_p2, %p790_p12 }
  0x20   : > { %p788_p11 = pneg %p787_p10 }
  0x22   : > { %p793_p5 = pnand %p792_p4, %p788_p11 }
  0x24   : > { %796 = shalt.err (!%p793_p5)
}
  0x25   : > { %707 = dma.hbm_to_vmem [thread:$0]  (!%p977_p8), %s161_s21, 1280, %s163_s18, %s150_s22  }
  0x26   : > { %171 = sbr.rel (%p936_p3) target bundleno = 275 (0x113), region = 32  ;;  %s998_s5 = sand.u32 (!%p936_p3), 1, %s874_s13  }
  0x27   : > { %s691_s7 = smul.u32 (!%p936_p3), 80, %s998_s5  ;;  %s174_s11 = scalar_lea.sflag (!%p936_p3), [#allocation3], %s998_s5 }
  0x29   : > { %s1002_s16 = scalar_lea.vmem (!%p936_p3), [#allocation2], %s691_s7 }
  0x2b   : > { %857 = dma.done.wait (%p963_p13), %s174_s11, 1280  }
  0x2c   : > { %859 = vsyncadd (%p963_p13), %s174_s11, 4294966016 }
  0x2d   : > { %861 = dma.done.wait (%p41_p1), [#allocation6], 20480  }
  0x2e   : > { %863 = vsyncadd (%p41_p1), [#allocation6], 4294946816  ;;  %v231_v0 = vld [vmem:[#allocation5 + $0x78] sm:$0xff]  ;;  %v230_v1 = vld [vmem:[#allocation5 + $0x70] sm:$0xff]  ;;  %s684_s8 = sshll.u32 %s998_s5, 3  ;;  %s686_s17 = sshll.u32 %s931_s19, 3 }
  0x2f   : > { %v247_v2 = vld [vmem:[#allocation5 + $0xf8] sm:$0xff]  ;;  %380 = vmatpush.msra.mxu0 %v231_v0  ;;  %v246_v3 = vld [vmem:[#allocation5 + $0xf0] sm:$0xff]  ;;  %v229_v4 = vld [vmem:[#allocation5 + $0x68] sm:$0xff]  ;;  %s592_s22 = scalar_lea.hbm %s1062_s3, %s686_s17  ;;  %s205_s23 = scalar_lea.vmem [#allocation7], %s684_s8 }
  0x30   : > { %400 = vmatpush.msra.mxu1 %v247_v2  ;;  %v245_v5 = vld [vmem:[#allocation5 + $0xe8] sm:$0xff]  ;;  %v263_v6 = vld [vmem:[#allocation5 + $0x178] sm:$0xff]  ;;  %v262_v7 = vld [vmem:[#allocation5 + $0x170] sm:$0xff]  ;;  %s594_s24 = sshll.u32 %s205_s23, 4  ;;  %s596_s25 = sshll.u32 %s592_s22, 4  ;;  %s595_s24 = int_to_ptr.vmem [resolvable:$true] %s594_s24  ;;  %s597_s25 = int_to_ptr.hbm [resolvable:$true] %s596_s25 }
  0x31   : > { %381 = vmatpush.msra.mxu0 %v230_v1  ;;  %v279_v8 = vld [vmem:[#allocation5 + $0x1f8] sm:$0xff]  ;;  %v228_v9 = vld [vmem:[#allocation5 + $0x60] sm:$0xff]  ;;  %420 = vmatpush.msra.mxu2 %v263_v6  ;;  %v261_v11 = vld [vmem:[#allocation5 + $0x168] sm:$0xff]  ;;  %s582_s27 = scalar_lea.sflag [#allocation4], %s998_s5  ;;  %s826_s19 = sshra.s32 %s597_s25, 4  ;;  %s827_s19 = int_to_ptr.hbm [resolvable:$true] %s826_s19 }
  0x32   : > { %401 = vmatpush.msra.mxu1 %v246_v3  ;;  %v244_v10 = vld [vmem:[#allocation5 + $0xe0] sm:$0xff]  ;;  %440 = vmatpush.msra.mxu3 %v279_v8  ;;  %v278_v12 = vld [vmem:[#allocation5 + $0x1f0] sm:$0xff]  ;;  %v227_v13 = vld [vmem:[#allocation5 + $0x58] sm:$0xff]  ;;  %s828_s28 = scalar_lea.hbm %s827_s19, 8  ;;  %s832_s7 = scalar_lea.hbm %s1062_s3, 16 }
  0x33   : > { %382 = vmatpush.msra.mxu0 %v229_v4  ;;  %421 = vmatpush.msra.mxu2 %v262_v7  ;;  %v243_v14 = vld [vmem:[#allocation5 + $0xd8] sm:$0xff]  ;;  %v277_v15 = vld [vmem:[#allocation5 + $0x1e8] sm:$0xff]  ;;  %v260_v16 = vld [vmem:[#allocation5 + $0x160] sm:$0xff]  ;;  %p829_p1 = scmp.ne.s32.totalorder %s827_s19, %s828_s28  ;;  %p833_p13 = scmp.lt.s32.totalorder %s827_s19, %s1062_s3 }
  0x34   : > { %402 = vmatpush.msra.mxu1 %v245_v5  ;;  %441 = vmatpush.msra.mxu3 %v278_v12  ;;  %v276_v17 = vld [vmem:[#allocation5 + $0x1e0] sm:$0xff]  ;;  %v226_v18 = vld [vmem:[#allocation5 + $0x50] sm:$0xff]  ;;  %v259_v20 = vld [vmem:[#allocation5 + $0x158] sm:$0xff]  ;;  %p834_p8 = scmp.lt.s32.totalorder %s832_s7, %s828_s28 }
  0x35   : > { %383 = vmatpush.msra.mxu0 %v228_v9  ;;  %422 = vmatpush.msra.mxu2 %v261_v11  ;;  %v242_v19 = vld [vmem:[#allocation5 + $0xd0] sm:$0xff]  ;;  %v275_v21 = vld [vmem:[#allocation5 + $0x1d8] sm:$0xff]  ;;  %v225_v22 = vld [vmem:[#allocation5 + $0x48] sm:$0xff]  ;;  %p830_p3 = pnand %p829_p1, %p967_p0 }
  0x36   : > { %403 = vmatpush.msra.mxu1 %v244_v10  ;;  %442 = vmatpush.msra.mxu3 %v277_v15  ;;  %v241_v23 = vld [vmem:[#allocation5 + $0xc8] sm:$0xff]  ;;  %v258_v24 = vld [vmem:[#allocation5 + $0x150] sm:$0xff]  ;;  %v224_v26 = vld [vmem:[#allocation5 + $0x40] sm:$0xff]  ;;  %p835_p7 = por %p834_p8, %p833_p13 }
  0x37   : > { %384 = vmatpush.msra.mxu0 %v227_v13  ;;  %423 = vmatpush.msra.mxu2 %v260_v16  ;;  %v274_v25 = vld [vmem:[#allocation5 + $0x1d0] sm:$0xff]  ;;  %v240_v27 = vld [vmem:[#allocation5 + $0xc0] sm:$0xff]  ;;  %v257_v28 = vld [vmem:[#allocation5 + $0x148] sm:$0xff]  ;;  %p831_p5 = pneg %p830_p3 }
  0x38   : > { %404 = vmatpush.msra.mxu1 %v243_v14  ;;  %443 = vmatpush.msra.mxu3 %v276_v17  ;;  %v273_v29 = vld [vmem:[#allocation5 + $0x1c8] sm:$0xff]  ;;  %v223_v30 = vld [vmem:[#allocation5 + $0x38] sm:$0xff]  ;;  %v256_v32 = vld [vmem:[#allocation5 + $0x140] sm:$0xff] }
  0x39   : > { %385 = vmatpush.msra.mxu0 %v226_v18  ;;  %424 = vmatpush.msra.mxu2 %v259_v20  ;;  %v239_v31 = vld [vmem:[#allocation5 + $0xb8] sm:$0xff]  ;;  %v272_v33 = vld [vmem:[#allocation5 + $0x1c0] sm:$0xff]  ;;  %v222_v34 = vld [vmem:[#allocation5 + $0x30] sm:$0xff]  ;;  %p836_p9 = pnand %p835_p7, %p831_p5 }
  0x3a   : > { %405 = vmatpush.msra.mxu1 %v242_v19  ;;  %444 = vmatpush.msra.mxu3 %v275_v21  ;;  %v238_v35 = vld [vmem:[#allocation5 + $0xb0] sm:$0xff]  ;;  %v255_v36 = vld [vmem:[#allocation5 + $0x138] sm:$0xff]  ;;  %v221_v38 = vld [vmem:[#allocation5 + $0x28] sm:$0xff] }
  0x3b   : > { %386 = vmatpush.msra.mxu0 %v225_v22  ;;  %425 = vmatpush.msra.mxu2 %v258_v24  ;;  %v271_v37 = vld [vmem:[#allocation5 + $0x1b8] sm:$0xff]  ;;  %v237_v39 = vld [vmem:[#allocation5 + $0xa8] sm:$0xff]  ;;  %v254_v40 = vld [vmem:[#allocation5 + $0x130] sm:$0xff] }
  0x3c   : > { %406 = vmatpush.msra.mxu1 %v241_v23  ;;  %445 = vmatpush.msra.mxu3 %v274_v25  ;;  %v270_v41 = vld [vmem:[#allocation5 + $0x1b0] sm:$0xff]  ;;  %v220_v42 = vld [vmem:[#allocation5 + $0x20] sm:$0xff]  ;;  %v253_v44 = vld [vmem:[#allocation5 + $0x128] sm:$0xff] }
  0x3d   : > { %387 = vmatpush.msra.mxu0 %v224_v26  ;;  %426 = vmatpush.msra.mxu2 %v257_v28  ;;  %v236_v43 = vld [vmem:[#allocation5 + $0xa0] sm:$0xff]  ;;  %v269_v45 = vld [vmem:[#allocation5 + $0x1a8] sm:$0xff]  ;;  %v219_v46 = vld [vmem:[#allocation5 + $0x18] sm:$0xff] }
  0x3e   : > { %407 = vmatpush.msra.mxu1 %v240_v27  ;;  %446 = vmatpush.msra.mxu3 %v273_v29  ;;  %v235_v47 = vld [vmem:[#allocation5 + $0x98] sm:$0xff]  ;;  %v252_v48 = vld [vmem:[#allocation5 + $0x120] sm:$0xff]  ;;  %v218_v50 = vld [vmem:[#allocation5 + $0x10] sm:$0xff] }
  0x3f   : > { %388 = vmatpush.msra.mxu0 %v223_v30  ;;  %427 = vmatpush.msra.mxu2 %v256_v32  ;;  %v268_v49 = vld [vmem:[#allocation5 + $0x1a0] sm:$0xff]  ;;  %v234_v51 = vld [vmem:[#allocation5 + $0x90] sm:$0xff]  ;;  %v251_v52 = vld [vmem:[#allocation5 + $0x118] sm:$0xff] }
  0x40   : > { %408 = vmatpush.msra.mxu1 %v239_v31  ;;  %447 = vmatpush.msra.mxu3 %v272_v33  ;;  %v267_v53 = vld [vmem:[#allocation5 + $0x198] sm:$0xff]  ;;  %v217_v54 = vld [vmem:[#allocation5 + $0x8] sm:$0xff]  ;;  %v250_v56 = vld [vmem:[#allocation5 + $0x110] sm:$0xff] }
  0x41   : > { %389 = vmatpush.msra.mxu0 %v222_v34  ;;  %428 = vmatpush.msra.mxu2 %v255_v36  ;;  %v233_v55 = vld [vmem:[#allocation5 + $0x88] sm:$0xff]  ;;  %v266_v57 = vld [vmem:[#allocation5 + $0x190] sm:$0xff]  ;;  %v216_v58 = vld [vmem:[#allocation5] sm:$0xff] }
  0x42   : > { %409 = vmatpush.msra.mxu1 %v238_v35  ;;  %448 = vmatpush.msra.mxu3 %v271_v37  ;;  %v232_v59 = vld [vmem:[#allocation5 + $0x80] sm:$0xff]  ;;  %v295_v60 = vld [vmem:[#allocation5 + $0x278] sm:$0xff]  ;;  %v249_v62 = vld [vmem:[#allocation5 + $0x108] sm:$0xff] }
  0x43   : > { %390 = vmatpush.msra.mxu0 %v221_v38  ;;  %429 = vmatpush.msra.mxu2 %v254_v40  ;;  %v311_v61 = vld [vmem:[#allocation5 + $0x2f8] sm:$0xff]  ;;  %v265_v63 = vld [vmem:[#allocation5 + $0x188] sm:$0xff]  ;;  %v294_v0 = vld [vmem:[#allocation5 + $0x270] sm:$0xff] }
  0x44   : > { %410 = vmatpush.msra.mxu1 %v237_v39  ;;  %449 = vmatpush.msra.mxu3 %v270_v41  ;;  %v310_v1 = vld [vmem:[#allocation5 + $0x2f0] sm:$0xff]  ;;  %v248_v2 = vld [vmem:[#allocation5 + $0x100] sm:$0xff]  ;;  %v293_v4 = vld [vmem:[#allocation5 + $0x268] sm:$0xff] }
  0x45   : > { %391 = vmatpush.msra.mxu0 %v220_v42  ;;  %430 = vmatpush.msra.mxu2 %v253_v44  ;;  %v264_v3 = vld [vmem:[#allocation5 + $0x180] sm:$0xff]  ;;  %v309_v5 = vld [vmem:[#allocation5 + $0x2e8] sm:$0xff]  ;;  %v327_v6 = vld [vmem:[#allocation5 + $0x378] sm:$0xff] }
  0x46   : > { %411 = vmatpush.msra.mxu1 %v236_v43  ;;  %450 = vmatpush.msra.mxu3 %v269_v45  ;;  %v343_v7 = vld [vmem:[#allocation5 + $0x3f8] sm:$0xff]  ;;  %v292_v8 = vld [vmem:[#allocation5 + $0x260] sm:$0xff]  ;;  %v326_v10 = vld [vmem:[#allocation5 + $0x370] sm:$0xff] }
  0x47   : > { %392 = vmatpush.msra.mxu0 %v219_v46  ;;  %431 = vmatpush.msra.mxu2 %v252_v48  ;;  %v308_v9 = vld [vmem:[#allocation5 + $0x2e0] sm:$0xff]  ;;  %v342_v11 = vld [vmem:[#allocation5 + $0x3f0] sm:$0xff]  ;;  %v291_v12 = vld [vmem:[#allocation5 + $0x258] sm:$0xff] }
  0x48   : > { %412 = vmatpush.msra.mxu1 %v235_v47  ;;  %451 = vmatpush.msra.mxu3 %v268_v49  ;;  %v307_v13 = vld [vmem:[#allocation5 + $0x2d8] sm:$0xff]  ;;  %v325_v14 = vld [vmem:[#allocation5 + $0x368] sm:$0xff]  ;;  %v290_v16 = vld [vmem:[#allocation5 + $0x250] sm:$0xff] }
  0x49   : > { %393 = vmatpush.msra.mxu0 %v218_v50  ;;  %432 = vmatpush.msra.mxu2 %v251_v52  ;;  %v341_v15 = vld [vmem:[#allocation5 + $0x3e8] sm:$0xff]  ;;  %v306_v17 = vld [vmem:[#allocation5 + $0x2d0] sm:$0xff]  ;;  %v324_v18 = vld [vmem:[#allocation5 + $0x360] sm:$0xff] }
  0x4a   : > { %413 = vmatpush.msra.mxu1 %v234_v51  ;;  %452 = vmatpush.msra.mxu3 %v267_v53  ;;  %v340_v19 = vld [vmem:[#allocation5 + $0x3e0] sm:$0xff]  ;;  %v289_v20 = vld [vmem:[#allocation5 + $0x248] sm:$0xff]  ;;  %v323_v22 = vld [vmem:[#allocation5 + $0x358] sm:$0xff] }
  0x4b   : > { %394 = vmatpush.msra.mxu0 %v217_v54  ;;  %433 = vmatpush.msra.mxu2 %v250_v56  ;;  %v305_v21 = vld [vmem:[#allocation5 + $0x2c8] sm:$0xff]  ;;  %v339_v23 = vld [vmem:[#allocation5 + $0x3d8] sm:$0xff]  ;;  %v288_v24 = vld [vmem:[#allocation5 + $0x240] sm:$0xff] }
  0x4c   : > { %414 = vmatpush.msra.mxu1 %v233_v55  ;;  %453 = vmatpush.msra.mxu3 %v266_v57  ;;  %v304_v25 = vld [vmem:[#allocation5 + $0x2c0] sm:$0xff]  ;;  %v322_v26 = vld [vmem:[#allocation5 + $0x350] sm:$0xff]  ;;  %v287_v28 = vld [vmem:[#allocation5 + $0x238] sm:$0xff] }
  0x4d   : > { %395 = vmatpush.msra.mxu0 %v216_v58  ;;  %434 = vmatpush.msra.mxu2 %v249_v62  ;;  %v338_v27 = vld [vmem:[#allocation5 + $0x3d0] sm:$0xff]  ;;  %v303_v29 = vld [vmem:[#allocation5 + $0x2b8] sm:$0xff]  ;;  %v321_v30 = vld [vmem:[#allocation5 + $0x348] sm:$0xff] }
  0x4e   : > { %415 = vmatpush.msra.mxu1 %v232_v59  ;;  %454 = vmatpush.msra.mxu3 %v265_v63  ;;  %v337_v31 = vld [vmem:[#allocation5 + $0x3c8] sm:$0xff]  ;;  %v286_v32 = vld [vmem:[#allocation5 + $0x230] sm:$0xff]  ;;  %v320_v34 = vld [vmem:[#allocation5 + $0x340] sm:$0xff] }
  0x4f   : > { %460 = vmatpush.msrb.mxu0 %v295_v60  ;;  %435 = vmatpush.msra.mxu2 %v248_v2  ;;  %v302_v33 = vld [vmem:[#allocation5 + $0x2b0] sm:$0xff]  ;;  %v336_v35 = vld [vmem:[#allocation5 + $0x3c0] sm:$0xff]  ;;  %v285_v36 = vld [vmem:[#allocation5 + $0x228] sm:$0xff] }
  0x50   : > { %480 = vmatpush.msrb.mxu1 %v311_v61  ;;  %455 = vmatpush.msra.mxu3 %v264_v3  ;;  %v301_v37 = vld [vmem:[#allocation5 + $0x2a8] sm:$0xff]  ;;  %v319_v38 = vld [vmem:[#allocation5 + $0x338] sm:$0xff]  ;;  %v284_v40 = vld [vmem:[#allocation5 + $0x220] sm:$0xff] }
  0x51   : > { %461 = vmatpush.msrb.mxu0 %v294_v0  ;;  %500 = vmatpush.msrb.mxu2 %v327_v6  ;;  %v335_v39 = vld [vmem:[#allocation5 + $0x3b8] sm:$0xff]  ;;  %v300_v41 = vld [vmem:[#allocation5 + $0x2a0] sm:$0xff]  ;;  %v318_v42 = vld [vmem:[#allocation5 + $0x330] sm:$0xff] }
  0x52   : > { %481 = vmatpush.msrb.mxu1 %v310_v1  ;;  %520 = vmatpush.msrb.mxu3 %v343_v7  ;;  %v334_v43 = vld [vmem:[#allocation5 + $0x3b0] sm:$0xff]  ;;  %v283_v44 = vld [vmem:[#allocation5 + $0x218] sm:$0xff]  ;;  %v317_v46 = vld [vmem:[#allocation5 + $0x328] sm:$0xff] }
  0x53   : > { %462 = vmatpush.msrb.mxu0 %v293_v4  ;;  %501 = vmatpush.msrb.mxu2 %v326_v10  ;;  %v299_v45 = vld [vmem:[#allocation5 + $0x298] sm:$0xff]  ;;  %v333_v47 = vld [vmem:[#allocation5 + $0x3a8] sm:$0xff]  ;;  %v282_v48 = vld [vmem:[#allocation5 + $0x210] sm:$0xff] }
  0x54   : > { %482 = vmatpush.msrb.mxu1 %v309_v5  ;;  %521 = vmatpush.msrb.mxu3 %v342_v11  ;;  %v298_v49 = vld [vmem:[#allocation5 + $0x290] sm:$0xff]  ;;  %v316_v50 = vld [vmem:[#allocation5 + $0x320] sm:$0xff]  ;;  %v281_v52 = vld [vmem:[#allocation5 + $0x208] sm:$0xff] }
  0x55   : > { %463 = vmatpush.msrb.mxu0 %v292_v8  ;;  %502 = vmatpush.msrb.mxu2 %v325_v14  ;;  %v332_v51 = vld [vmem:[#allocation5 + $0x3a0] sm:$0xff]  ;;  %v297_v54 = vld [vmem:[#allocation5 + $0x288] sm:$0xff]  ;;  %v315_v55 = vld [vmem:[#allocation5 + $0x318] sm:$0xff] }
  0x56   : > { %483 = vmatpush.msrb.mxu1 %v308_v9  ;;  %522 = vmatpush.msrb.mxu3 %v341_v15  ;;  %v208_v53 = vld [vmem:[%s1002_s16 + $0x10] sm:$0xff]  ;;  %v209_v57 = vld [vmem:[%s1002_s16 + $0x18] sm:$0xff]  ;;  %v206_v58 = vld [vmem:[%s1002_s16] sm:$0xff] }
  0x57   : > { %464 = vmatpush.msrb.mxu0 %v291_v12  ;;  %503 = vmatpush.msrb.mxu2 %v324_v18  ;;  %v280_v56 = vld [vmem:[#allocation5 + $0x200] sm:$0xff]  ;;  %v359_v60 = vld [vmem:[#allocation5 + $0x478] sm:$0xff]  ;;  %v314_v61 = vld [vmem:[#allocation5 + $0x310] sm:$0xff] }
  0x58   : > { %484 = vmatpush.msrb.mxu1 %v307_v13  ;;  %523 = vmatpush.msrb.mxu3 %v340_v19  ;;  %v296_v59 = vld [vmem:[#allocation5 + $0x280] sm:$0xff]  ;;  %v331_v62 = vld [vmem:[#allocation5 + $0x398] sm:$0xff]  ;;  %v358_v0 = vld [vmem:[#allocation5 + $0x470] sm:$0xff] }
  0x59   : > { %465 = vmatpush.msrb.mxu0 %v290_v16  ;;  %504 = vmatpush.msrb.mxu2 %v323_v22  ;;  %v207_v63 = vld [vmem:[%s1002_s16 + $0x8] sm:$0xff]  ;;  %v330_v3 = vld [vmem:[#allocation5 + $0x390] sm:$0xff]  ;;  %v312_v6 = vld [vmem:[#allocation5 + $0x300] sm:$0xff] }
  0x5a   : > { %485 = vmatpush.msrb.mxu1 %v306_v17  ;;  %524 = vmatpush.msrb.mxu3 %v339_v23  ;;  %v375_v1 = vld [vmem:[#allocation5 + $0x4f8] sm:$0xff]  ;;  %v313_v2 = vld [vmem:[#allocation5 + $0x308] sm:$0xff]  ;;  %v374_v5 = vld [vmem:[#allocation5 + $0x4f0] sm:$0xff] }
  0x5b   : > { %466 = vmatpush.msrb.mxu0 %v289_v20  ;;  %505 = vmatpush.msrb.mxu2 %v322_v26  ;;  %v357_v4 = vld [vmem:[#allocation5 + $0x468] sm:$0xff]  ;;  %v212_v8 = vld [vmem:[%s1002_s16 + $0x30] sm:$0xff]  ;;  %v210_v12 = vld [vmem:[%s1002_s16 + $0x20] sm:$0xff] }
  0x5c   : > { %486 = vmatpush.msrb.mxu1 %v305_v21  ;;  %525 = vmatpush.msrb.mxu3 %v338_v27  ;;  %v329_v7 = vld [vmem:[#allocation5 + $0x388] sm:$0xff]  ;;  %v356_v9 = vld [vmem:[#allocation5 + $0x460] sm:$0xff]  ;;  %v355_v14 = vld [vmem:[#allocation5 + $0x458] sm:$0xff] }
  0x5d   : > { %467 = vmatpush.msrb.mxu0 %v288_v24  ;;  %506 = vmatpush.msrb.mxu2 %v321_v30  ;;  %v373_v10 = vld [vmem:[#allocation5 + $0x4e8] sm:$0xff]  ;;  %v328_v11 = vld [vmem:[#allocation5 + $0x380] sm:$0xff]  ;;  %v354_v17 = vld [vmem:[#allocation5 + $0x450] sm:$0xff] }
  0x5e   : > { %487 = vmatpush.msrb.mxu1 %v304_v25  ;;  %526 = vmatpush.msrb.mxu3 %v337_v31  ;;  %v213_v13 = vld [vmem:[%s1002_s16 + $0x38] sm:$0xff]  ;;  %v372_v15 = vld [vmem:[#allocation5 + $0x4e0] sm:$0xff]  ;;  %v211_v16 = vld [vmem:[%s1002_s16 + $0x28] sm:$0xff] }
  0x5f   : > { %468 = vmatpush.msrb.mxu0 %v287_v28  ;;  %507 = vmatpush.msrb.mxu2 %v320_v34  ;;  %v371_v18 = vld [vmem:[#allocation5 + $0x4d8] sm:$0xff]  ;;  %v353_v19 = vld [vmem:[#allocation5 + $0x448] sm:$0xff]  ;;  %v370_v20 = vld [vmem:[#allocation5 + $0x4d0] sm:$0xff] }
  0x60   : > { %488 = vmatpush.msrb.mxu1 %v303_v29  ;;  %527 = vmatpush.msrb.mxu3 %v336_v35  ;;  %v352_v21 = vld [vmem:[#allocation5 + $0x440] sm:$0xff]  ;;  %v369_v22 = vld [vmem:[#allocation5 + $0x4c8] sm:$0xff]  ;;  %v351_v23 = vld [vmem:[#allocation5 + $0x438] sm:$0xff] }
  0x61   : > { %469 = vmatpush.msrb.mxu0 %v286_v32  ;;  %508 = vmatpush.msrb.mxu2 %v319_v38  ;;  %v368_v24 = vld [vmem:[#allocation5 + $0x4c0] sm:$0xff]  ;;  %v350_v25 = vld [vmem:[#allocation5 + $0x430] sm:$0xff]  ;;  %v367_v26 = vld [vmem:[#allocation5 + $0x4b8] sm:$0xff] }
  0x62   : > { %489 = vmatpush.msrb.mxu1 %v302_v33  ;;  %528 = vmatpush.msrb.mxu3 %v335_v39  ;;  %v349_v27 = vld [vmem:[#allocation5 + $0x428] sm:$0xff]  ;;  %v366_v28 = vld [vmem:[#allocation5 + $0x4b0] sm:$0xff]  ;;  %v348_v29 = vld [vmem:[#allocation5 + $0x420] sm:$0xff] }
  0x63   : > { %470 = vmatpush.msrb.mxu0 %v285_v36  ;;  %509 = vmatpush.msrb.mxu2 %v318_v42  ;;  %v365_v30 = vld [vmem:[#allocation5 + $0x4a8] sm:$0xff]  ;;  %v347_v31 = vld [vmem:[#allocation5 + $0x418] sm:$0xff]  ;;  %v364_v32 = vld [vmem:[#allocation5 + $0x4a0] sm:$0xff] }
  0x64   : > { %490 = vmatpush.msrb.mxu1 %v301_v37  ;;  %529 = vmatpush.msrb.mxu3 %v334_v43  ;;  %v346_v33 = vld [vmem:[#allocation5 + $0x410] sm:$0xff]  ;;  %v363_v34 = vld [vmem:[#allocation5 + $0x498] sm:$0xff]  ;;  %v345_v35 = vld [vmem:[#allocation5 + $0x408] sm:$0xff] }
  0x65   : > { %471 = vmatpush.msrb.mxu0 %v284_v40  ;;  %510 = vmatpush.msrb.mxu2 %v317_v46  ;;  %v362_v36 = vld [vmem:[#allocation5 + $0x490] sm:$0xff]  ;;  %v344_v37 = vld [vmem:[#allocation5 + $0x400] sm:$0xff]  ;;  %v361_v38 = vld [vmem:[#allocation5 + $0x488] sm:$0xff] }
  0x66   : > { %491 = vmatpush.msrb.mxu1 %v300_v41  ;;  %530 = vmatpush.msrb.mxu3 %v333_v47  ;;  %v214_v39 = vld [vmem:[%s1002_s16 + $0x40] sm:$0xff]  ;;  %v215_v41 = vld [vmem:[%s1002_s16 + $0x48] sm:$0xff] }
  0x67   : > { %472 = vmatpush.msrb.mxu0 %v283_v44  ;;  %511 = vmatpush.msrb.mxu2 %v316_v50  ;;  %v360_v40 = vld [vmem:[#allocation5 + $0x480] sm:$0xff] }
  0x68   : > { %492 = vmatpush.msrb.mxu1 %v299_v45  ;;  %531 = vmatpush.msrb.mxu3 %v332_v51  ;;  %v751_v42 = vld [vmem:[%s1061_s2] ss:$0 sm:$0xff] }
  0x69   : > { %473 = vmatpush.msrb.mxu0 %v282_v48  ;;  %436 = vmatmul.f32.vlgmr.msra.gmra.mxu2 %v208_v53 }
  0x6a   : > { %493 = vmatpush.msrb.mxu1 %v298_v49  ;;  %512 = vmatpush.msrb.mxu2 %v315_v55 }
  0x6b   : > { %474 = vmatpush.msrb.mxu0 %v281_v52  ;;  %456 = vmatmul.f32.vlgmr.msra.gmra.mxu3 %v209_v57 }
  0x6c   : > { %494 = vmatpush.msrb.mxu1 %v297_v54  ;;  %396 = vmatmul.f32.vlgmr.msra.gmra.mxu0 %v206_v58 }
  0x6d   : > { %475 = vmatpush.msrb.mxu0 %v280_v56  ;;  %513 = vmatpush.msrb.mxu2 %v314_v61 }
  0x6e   : > { %495 = vmatpush.msrb.mxu1 %v296_v59  ;;  %532 = vmatpush.msrb.mxu3 %v331_v62 }
  0x6f   : > { %540 = vmatpush.msra.mxu0 %v359_v60  ;;  %416 = vmatmul.f32.vlgmr.msra.gmra.mxu1 %v207_v63 }
  0x70   : > { %560 = vmatpush.msra.mxu1 %v375_v1  ;;  %514 = vmatpush.msrb.mxu2 %v313_v2 }
  0x71   : > { %541 = vmatpush.msra.mxu0 %v358_v0  ;;  %533 = vmatpush.msrb.mxu3 %v330_v3 }
  0x72   : > { %561 = vmatpush.msra.mxu1 %v374_v5  ;;  %515 = vmatpush.msrb.mxu2 %v312_v6 }
  0x73   : > { %542 = vmatpush.msra.mxu0 %v357_v4  ;;  %534 = vmatpush.msrb.mxu3 %v329_v7 }
  0x74   : > { %516 = vmatmul.f32.vlgmr.msrb.gmra.mxu2 %v212_v8  ;;  %562 = vmatpush.msra.mxu1 %v373_v10 }
  0x75   : > { %543 = vmatpush.msra.mxu0 %v356_v9  ;;  %535 = vmatpush.msrb.mxu3 %v328_v11 }
  0x76   : > { %476 = vmatmul.f32.vlgmr.msrb.gmra.mxu0 %v210_v12  ;;  %536 = vmatmul.f32.vlgmr.msrb.gmra.mxu3 %v213_v13 }
  0x77   : > { %544 = vmatpush.msra.mxu0 %v355_v14  ;;  %563 = vmatpush.msra.mxu1 %v372_v15 }
  0x78   : > { %496 = vmatmul.f32.vlgmr.msrb.gmra.mxu1 %v211_v16 }
  0x79   : > { %545 = vmatpush.msra.mxu0 %v354_v17  ;;  %564 = vmatpush.msra.mxu1 %v371_v18 }
  0x7b   : > { %546 = vmatpush.msra.mxu0 %v353_v19  ;;  %565 = vmatpush.msra.mxu1 %v370_v20 }
  0x7d   : > { %547 = vmatpush.msra.mxu0 %v352_v21  ;;  %566 = vmatpush.msra.mxu1 %v369_v22 }
  0x7f   : > { %548 = vmatpush.msra.mxu0 %v351_v23  ;;  %567 = vmatpush.msra.mxu1 %v368_v24 }
  0x81   : > { %549 = vmatpush.msra.mxu0 %v350_v25  ;;  %568 = vmatpush.msra.mxu1 %v367_v26 }
  0x83   : > { %550 = vmatpush.msra.mxu0 %v349_v27  ;;  %569 = vmatpush.msra.mxu1 %v366_v28 }
  0x85   : > { %551 = vmatpush.msra.mxu0 %v348_v29  ;;  %570 = vmatpush.msra.mxu1 %v365_v30 }
  0x87   : > { %552 = vmatpush.msra.mxu0 %v347_v31  ;;  %571 = vmatpush.msra.mxu1 %v364_v32 }
  0x89   : > { %553 = vmatpush.msra.mxu0 %v346_v33  ;;  %572 = vmatpush.msra.mxu1 %v363_v34 }
  0x8b   : > { %554 = vmatpush.msra.mxu0 %v345_v35  ;;  %573 = vmatpush.msra.mxu1 %v362_v36 }
  0x8d   : > { %555 = vmatpush.msra.mxu0 %v344_v37  ;;  %574 = vmatpush.msra.mxu1 %v361_v38 }
  0x8e   : > { %556 = vmatmul.f32.vlgmr.msra.gmra.mxu0 %v214_v39 }
  0x8f   : > { %575 = vmatpush.msra.mxu1 %v360_v40 }
  0x90   : > { %576 = vmatmul.f32.vlgmr.msra.gmra.mxu1 %v215_v41 }
  0xe9   : > { %v397_v43 = vpop.f32.mrf.mxu0 }
  0xea   : > { %v398_v44 = vadd.f32 %v751_v42, %v397_v43 }
  0xec   : > { %v417_v45 = vpop.f32.mrf.mxu1  ;;  %v437_v47 = vpop.f32.mrf.mxu2 }
  0xed   : > { %v418_v46 = vadd.f32 %v417_v45, %v398_v44 }
  0xee   : > { %v457_v49 = vpop.f32.mrf.mxu3 }
  0xef   : > { %v438_v48 = vadd.f32 %v437_v47, %v418_v46 }
  0xf1   : > { %v458_v50 = vadd.f32 %v457_v49, %v438_v48 }
  0xf3   : > { %v477_v51 = vpop.f32.mrf.mxu0 }
  0xf4   : > { %v478_v52 = vadd.f32 %v477_v51, %v458_v50 }
  0xf5   : > { %v497_v53 = vpop.f32.mrf.mxu1 }
  0xf6   : > { %v498_v54 = vadd.f32 %v497_v53, %v478_v52 }
  0xf7   : > { %v517_v55 = vpop.f32.mrf.mxu2 }
  0xf8   : > { %v518_v56 = vadd.f32 %v517_v55, %v498_v54 }
  0xf9   : > { %v537_v57 = vpop.f32.mrf.mxu3 }
  0xfa   : > { %v538_v58 = vadd.f32 %v537_v57, %v518_v56 }
 0x10b   : > { %v557_v59 = vpop.f32.mrf.mxu0 }
 0x10c   : > { %v558_v60 = vadd.f32 %v557_v59, %v538_v58 }
 0x10d   : > { %v577_v61 = vpop.f32.mrf.mxu1 }
 0x10e   : > { %v578_v62 = vadd.f32 %v577_v61, %v558_v60 }
 0x110   : > { %580 = vst [vmem:[%s205_s23] sm:$0xff] %v578_v62 }
 0x111   : > { %839 = shalt.err (!%p836_p9)
}
 0x112   : > { %698 = dma.vmem_to_hbm [thread:$0]  (%p967_p0), %s595_s24, 128, %s597_s25, %s582_s27  }
 0x113 PF: > { %s608_s5 = sand.u32 1, %s870_s12   ;;  %p1068_p10 = scmp.ge.s32.totalorder %s882_s15, 2 }
 0x114   : > { %s609_s20 = scalar_lea.sflag [#allocation4], %s608_s5 }
 0x115   : > { %p709_p11 = pnand %p1068_p10, %p973_p6 }
 0x117   : > { %p710_p12 = pneg %p709_p11 }
 0x119   : > { %865 = dma.done.wait (%p710_p12), %s609_s20, 128  }
 0x11a   : > { %867 = vsyncadd (%p710_p12), %s609_s20, 4294967168  ;;  %p17_p2 = scmp.ge.s32.totalorder %s947_s26, 4   ;;  %s1069_s12 = smov %s874_s13 }
 0x11b   : > { %s1070_s13 = smov %s878_s14  ;;  %s1071_s14 = smov %s959_s29 }
 0x11c   : > { %s1072_s15 = smov %s947_s26  ;;  %19 = sbr.rel (!%p17_p2) target bundleno = 6 (0x6), region = 81 }
 0x121   :  { %615 = vsyncpa [#allocation3], 1 }
 0x122   :  { %617 = vsyncpa [#allocation3 + $0x1], 1 }
 0x123   :  { %618 = vsyncpa [#allocation6], 1 }
 0x124   :  { %619 = vsyncpa [#allocation4], 1 }
 0x125   :  { %621 = vsyncpa [#allocation4 + $0x1], 1 }

</bundles_post_ra>
